<compile_context>
chip_gen: v5e
topology: v5e:2x2
jax: 0.10.0
libtpu: 0.0.40
codegen_flags: <defaults>
</compile_context>

<pallas_src>
import jax
import jax.numpy as jnp
from jax.experimental import pallas as pl
from jax.experimental.pallas import tpu as pltpu

# ---------------- problem sizes ----------------
B, C_IN, H, W = 2, 4, 16, 16          # input (NCHW in PyTorch convention)
C_OUT, KH, KW = 8, 3, 3               # conv parameters (stride=1, pad=1)
HW = H * W                            # 256 pooled positions
KWC = W * C_IN                        # 64  = contraction elems per dy tap (no width pad)
K_FUSED = KH * KWC                    # 192 = fused contraction dim (all 3 dy taps)
LANES = W * C_OUT                     # 128 = output lanes, m = w*C_OUT + o


# ---------------- Pallas kernel ----------------
def feat_kernel(xs_ref, w_ref, b_ref, o_ref):
    # xs_ref: (B*H, K_FUSED)    bf16  dy-concatenated image rows (H zero-padded)
    # w_ref : (K_FUSED, LANES)  bf16  dx/channel-banded conv weight, dy-major
    # b_ref : (1, LANES)        f32   conv bias broadcast over the w-groups
    # o_ref : (B, LANES)        f32   pooled features (channel o in lane m with m%8==o)
    rows = xs_ref.shape[0]                                     # B*H (static)

    # Conv for all 3 dy taps in ONE MXU pass (bf16 operands, f32 accumulation).
    acc = jnp.dot(xs_ref[...], w_ref[...],
                  preferred_element_type=jnp.float32)          # (B*H, 128)
    y = jnp.maximum(acc + b_ref[...], 0.0)                     # bias + ReLU (VPU, f32)

    # Global average pool, stage 1: sum over the H output rows of each image
    # (sublane reduce on the (B, H, 128) view; reshape only splits leading dim).
    pooled = jnp.sum(y.reshape(rows // H, H, LANES), axis=1)   # (B, 128) f32

    # Stage 2: sum over the W lane-groups (lane m = w*C_OUT + o) with an XLU
    # roll tree.  After the tree every lane holds the sum of its channel
    # residue class (m % C_OUT); lanes 0..C_OUT-1 carry the real features.
    for shift in (64, 32, 16, 8):
        pooled = pooled + pltpu.roll(pooled, shift, axis=1)

    o_ref[...] = pooled * (1.0 / HW)                           # mean over H*W


# ---------------- wrapper: bind weights once, jit the per-image path ----------------
def make_feature_extracter(w_hwio, bias):
    """w_hwio: (KH, KW, C_in, C_out) f32; bias: (C_out,) f32.
    Returns a jitted forward(x_nchw) -> (B, C_out) features."""
    # --- parameter-derived constants, built ONCE (hoisted out of the call path) ---
    # banded weight: wb[dy*KWC + w_in*C_in + c, w*C_out + o] = w_hwio[dy, dx, c, o]
    # with dx = w_in - w + 1; out-of-range dx has no band entry (== zero pad).
    kk = jnp.arange(KWC)
    mm = jnp.arange(LANES)
    w_in, c_in = kk[:, None] // C_IN, kk[:, None] % C_IN          # (64, 1)
    w_out, o_out = mm[None, :] // C_OUT, mm[None, :] % C_OUT      # (1, 128)
    dx = w_in - w_out + 1                                         # (64, 128)
    valid = (dx >= 0) & (dx < KW)
    dx_c = jnp.clip(dx, 0, KW - 1)
    wb = jnp.concatenate(
        [jnp.where(valid, w_hwio[dy, dx_c, c_in, o_out], 0.0) for dy in range(KH)],
        axis=0).astype(jnp.bfloat16)                              # (192, 128)
    bias_full = jnp.tile(bias, W).reshape(1, LANES).astype(jnp.float32)

    @jax.jit
    def forward(x_nchw):
        b = x_nchw.shape[0]
        # image prep: NCHW -> per-row (W*C_in) layout, zero-pad only along H,
        # then concatenate the 3 dy-shifted views along the contraction dim.
        x_rows = jnp.transpose(x_nchw, (0, 2, 3, 1)).reshape(b, H, KWC)   # (B, H, 64)
        x_padh = jnp.pad(x_rows, ((0, 0), (1, 1), (0, 0)))                # (B, H+2, 64)
        xs = jnp.concatenate([x_padh[:, dy:dy + H, :] for dy in range(KH)],
                             axis=-1)                                     # (B, H, 192)
        xs = xs.reshape(b * H, K_FUSED).astype(jnp.bfloat16)              # (32, 192)

        out = pl.pallas_call(
            feat_kernel,
            out_shape=jax.ShapeDtypeStruct((b, LANES), jnp.float32),
            grid_spec=pltpu.PrefetchScalarGridSpec(
                num_scalar_prefetch=0,
                grid=(1,),                      # whole batch fused into one grid step
                in_specs=[
                    pl.BlockSpec((b * H, K_FUSED), lambda i: (0, 0)),
                    pl.BlockSpec((K_FUSED, LANES), lambda i: (0, 0)),
                    pl.BlockSpec((1, LANES), lambda i: (0, 0)),
                ],
                out_specs=pl.BlockSpec((b, LANES), lambda i: (0, 0)),
            ),
            # TODO(synk): for large batches, grid over B*H tiles with
            # dimension_semantics=("parallel",) so both v7x TCs get work.
            compiler_params=pltpu.CompilerParams(
                dimension_semantics=("arbitrary",)),
        )(xs, wb, bias_full)

        # .view(B, -1): the real features live in the first C_OUT lanes
        return out[:, :C_OUT]

    return forward


# ---------------- pure-JAX reference (f32, for the sanity check) ----------------
def feature_extracter_ref(x_nchw, w_hwio, bias):
    x_nhwc = jnp.transpose(x_nchw, (0, 2, 3, 1))
    y = jax.lax.conv_general_dilated(
        x_nhwc, w_hwio, window_strides=(1, 1), padding="SAME",
        dimension_numbers=("NHWC", "HWIO", "NHWC"))
    y = jnp.maximum(y + bias[None, None, None, :], 0.0)
    return jnp.mean(y, axis=(1, 2))                               # (B, C_out)


if __name__ == "__main__":
    key = jax.random.PRNGKey(0)
    kx, kw, kb = jax.random.split(key, 3)

    x = jax.random.normal(kx, (B, C_IN, H, W), dtype=jnp.float32)
    # Deterministic synthetic conv parameters (HWIO layout).
    w = 0.1 * jax.random.normal(kw, (KH, KW, C_IN, C_OUT), dtype=jnp.float32)
    bias = 0.05 * jax.random.normal(kb, (C_OUT,), dtype=jnp.float32)

    fwd = make_feature_extracter(w, bias)     # constants built once here
    feats = jax.block_until_ready(fwd(x))
    ref = feature_extracter_ref(x, w, bias)

    assert feats.shape == (B, C_OUT)
    # bf16 matmul inputs (f32 accumulation) -> looser tolerance than pure f32.
    assert jnp.allclose(feats, ref, atol=2e-2, rtol=2e-2), jnp.max(jnp.abs(feats - ref))

    print("KERNEL_OK")
</pallas_src>

<mosaic_0001>
module attributes {stable_mosaic.version = 11 : i64} {
  func.func @feat_kernel(%arg0: i32, %arg1: memref<32x192xbf16, #tpu.memory_space<vmem>>, %arg2: memref<192x128xbf16, #tpu.memory_space<vmem>>, %arg3: memref<1x128xf32, #tpu.memory_space<vmem>>, %arg4: memref<2x128xf32, #tpu.memory_space<vmem>>) attributes {dimension_semantics = [#tpu.dimension_semantics<arbitrary>], iteration_bounds = array<i64: 1>, scalar_prefetch = 0 : i64, scratch_operands = 0 : i64, tpu.core_type = #tpu.core_type<tc>, window_params = [{pipeline_mode = #tpu.pipeline_mode<synchronous>, transform_indices = @transform_0, window_bounds = array<i64: 32, 192>}, {pipeline_mode = #tpu.pipeline_mode<synchronous>, transform_indices = @transform_1, window_bounds = array<i64: 192, 128>}, {pipeline_mode = #tpu.pipeline_mode<synchronous>, transform_indices = @transform_2, window_bounds = array<i64: 1, 128>}, {pipeline_mode = #tpu.pipeline_mode<synchronous>, transform_indices = @transform_3, window_bounds = array<i64: 2, 128>}]} {
    %c0 = arith.constant 0 : index
    %c0_0 = arith.constant 0 : index
    %0 = vector.load %arg1[%c0, %c0_0] : memref<32x192xbf16, #tpu.memory_space<vmem>>, vector<32x192xbf16>
    %c0_1 = arith.constant 0 : index
    %c0_2 = arith.constant 0 : index
    %1 = vector.load %arg2[%c0_1, %c0_2] : memref<192x128xbf16, #tpu.memory_space<vmem>>, vector<192x128xbf16>
    %cst = arith.constant dense<0.000000e+00> : vector<32x128xf32>
    %2 = tpu.matmul %0, %1, %cst {dimension_numbers = #tpu.dot_dimension_numbers<[1], [0], [0], [1], [0, 0, 1, 1], [], []>} : vector<32x192xbf16>, vector<192x128xbf16>, vector<32x128xf32> -> vector<32x128xf32>
    %c0_3 = arith.constant 0 : index
    %c0_4 = arith.constant 0 : index
    %3 = vector.load %arg3[%c0_3, %c0_4] : memref<1x128xf32, #tpu.memory_space<vmem>>, vector<1x128xf32>
    %4 = vector.broadcast %3 : vector<1x128xf32> to vector<32x128xf32>
    %5 = arith.addf %2, %4 : vector<32x128xf32>
    %cst_5 = arith.constant 0.000000e+00 : f32
    %6 = vector.broadcast %cst_5 : f32 to vector<32x128xf32>
    %7 = arith.maximumf %5, %6 : vector<32x128xf32>
    %8 = vector.shape_cast %7 : vector<32x128xf32> to vector<2x16x128xf32>
    %cst_6 = arith.constant dense<0.000000e+00> : vector<2x128xf32>
    %9 = vector.multi_reduction <add>, %8, %cst_6 [1] : vector<2x16x128xf32> to vector<2x128xf32>
    %c64_i32 = arith.constant 64 : i32
    %10 = tpu.dynamic_rotate %9 by %c64_i32 dim 1 : vector<2x128xf32>, i32 -> vector<2x128xf32>
    %11 = arith.addf %9, %10 : vector<2x128xf32>
    %c32_i32 = arith.constant 32 : i32
    %12 = tpu.dynamic_rotate %11 by %c32_i32 dim 1 : vector<2x128xf32>, i32 -> vector<2x128xf32>
    %13 = arith.addf %11, %12 : vector<2x128xf32>
    %c16_i32 = arith.constant 16 : i32
    %14 = tpu.dynamic_rotate %13 by %c16_i32 dim 1 : vector<2x128xf32>, i32 -> vector<2x128xf32>
    %15 = arith.addf %13, %14 : vector<2x128xf32>
    %c8_i32 = arith.constant 8 : i32
    %16 = tpu.dynamic_rotate %15 by %c8_i32 dim 1 : vector<2x128xf32>, i32 -> vector<2x128xf32>
    %17 = arith.addf %15, %16 : vector<2x128xf32>
    %cst_7 = arith.constant 3.906250e-03 : f32
    %18 = vector.broadcast %cst_7 : f32 to vector<2x128xf32>
    %19 = arith.mulf %17, %18 : vector<2x128xf32>
    %c0_8 = arith.constant 0 : index
    %c0_9 = arith.constant 0 : index
    %20 = vector.load %arg4[%c0_8, %c0_9] : memref<2x128xf32, #tpu.memory_space<vmem>>, vector<2x128xf32>
    tpu.vector_store %arg4[%c0_8, %c0_9], %19 {strides = array<i32>} : memref<2x128xf32, #tpu.memory_space<vmem>>, vector<2x128xf32>,
    return
  }
  func.func @transform_0(%arg0: i32) -> (i32, i32) {
    %c0_i32 = arith.constant 0 : i32
    %c0_i32_0 = arith.constant 0 : i32
    %c0_i32_1 = arith.constant 0 : i32
    return %c0_i32, %c0_i32_0 : i32, i32
  }
  func.func @transform_1(%arg0: i32) -> (i32, i32) {
    %c0_i32 = arith.constant 0 : i32
    %c0_i32_0 = arith.constant 0 : i32
    %c0_i32_1 = arith.constant 0 : i32
    return %c0_i32, %c0_i32_0 : i32, i32
  }
  func.func @transform_2(%arg0: i32) -> (i32, i32) {
    %c0_i32 = arith.constant 0 : i32
    %c0_i32_0 = arith.constant 0 : i32
    %c0_i32_1 = arith.constant 0 : i32
    return %c0_i32, %c0_i32_0 : i32, i32
  }
  func.func @transform_3(%arg0: i32) -> (i32, i32) {
    %c0_i32 = arith.constant 0 : i32
    %c0_i32_0 = arith.constant 0 : i32
    %c0_i32_1 = arith.constant 0 : i32
    return %c0_i32, %c0_i32_0 : i32, i32
  }
}

</mosaic_0001>

<bundles_post_ra>
// kernel: forward.1
= control target key start
LH: loop header
LB: loop body
LE: loop exit
PB: predicated region body
PF: predicated region fallthrough
CT: control target
= control target key end

     0   :  { %s497_s0 = inlined_call_operand.vmem [shape: bf16[32,192], index: 0, kind: input, shape index: {}]   ;;  %s498_s1 = inlined_call_operand.vmem [shape: bf16[192,128], index: 1, kind: input, shape index: {}]   ;;  %s499_s2 = inlined_call_operand.vmem [shape: f32[1,128], index: 2, kind: input, shape index: {}]   ;;  %s500_s3 = inlined_call_operand.hbm [shape: f32[2,128], index: 3, kind: output, shape index: {}]  }
   0x1   :  { %v354_v0 = vld [vmem:[%s498_s1 + $0x38] sm:$0xff]  ;;  %v353_v2 = vld [vmem:[%s498_s1 + $0x30] sm:$0xff]  ;;  %v352_v4 = vld [vmem:[%s498_s1 + $0x28] sm:$0xff] }
   0x2   :  { %v358_v1 = vld [vmem:[%s498_s1 + $0x58] sm:$0xff]  ;;  %145 = vmatpush.bf16.msra.mxu0 %v354_v0  ;;  %359 = vmatpush.bf16.msra.mxu2 %v354_v0  ;;  %v357_v3 = vld [vmem:[%s498_s1 + $0x50] sm:$0xff]  ;;  %v356_v5 = vld [vmem:[%s498_s1 + $0x48] sm:$0xff] }
   0x3   :  { %168 = vmatpush.bf16.msra.mxu1 %v358_v1 }
   0x6   :  { %146 = vmatpush.bf16.msra.mxu0 %v353_v2  ;;  %360 = vmatpush.bf16.msra.mxu2 %v353_v2 }
   0x7   :  { %169 = vmatpush.bf16.msra.mxu1 %v357_v3 }
   0x8   :  { %8 = vsyncpa [#allocation3], 0  ;;  %v351_v6 = vld [vmem:[%s498_s1 + $0x20] sm:$0xff]  ;;  %v281_v9 = vld [vmem:[%s497_s0 + $0x8] sm:$0xf0]  ;;  %vm138_vm0 = vcmask 523264  }
   0x9   :  { %v355_v7 = vld [vmem:[%s498_s1 + $0x40] sm:$0xff]  ;;  %v350_v11 = vld [vmem:[%s498_s1 + $0x18] sm:$0xff]  ;;  %v349_v12 = vld [vmem:[%s498_s1 + $0x10] sm:$0xff]  ;;  %vm203_vm1 = vcmask 1041409   ;;  %s401_s26 = smov 16   ;;  %s402_s27 = smov 8  }
   0xa   :  { %147 = vmatpush.bf16.msra.mxu0 %v352_v4  ;;  %361 = vmatpush.bf16.msra.mxu2 %v352_v4  ;;  %v343_v8 = vld [vmem:[%s497_s0 + $0x4] sm:$0xf]  ;;  %v348_v13 = vld [vmem:[%s498_s1 + $0x8] sm:$0xff]  ;;  %v279_v15 = vld [vmem:[%s497_s0] sm:$0xf]  ;;  %s403_s28 = smov [#allocation2]  }
   0xb   :  { %170 = vmatpush.bf16.msra.mxu1 %v356_v5  ;;  %v284_v10 = vor.u32 %v343_v8, %v281_v9  ;;  %v347_v14 = vld [vmem:[%s498_s1] sm:$0xff]  ;;  %v344_v16 = vld [vmem:[%s497_s0 + $0x4] sm:$0xf0]  ;;  %v287_v17 = vld [vmem:[%s497_s0 + $0x10] sm:$0xf]  ;;  %s266_s29 = sshll.u32 %s403_s28, 4  ;;  %s267_s29 = int_to_ptr.vmem [resolvable:$true] %s266_s29 }
   0xc   :  { %v346_v18 = vld [vmem:[%s497_s0 + $0x14] sm:$0xf0]  ;;  %v345_v19 = vld [vmem:[%s497_s0 + $0x14] sm:$0xf]  ;;  %v289_v20 = vld [vmem:[%s497_s0 + $0x18] sm:$0xf0]  ;;  %v280_v21 = vor.u32 %v344_v16, %v279_v15 }
   0xd   :  { %v288_v22 = vor.u32 %v346_v18, %v287_v17  ;;  %v292_v23 = vor.u32 %v345_v19, %v289_v20  ;;  %v372_v27 = vld [vmem:[%s499_s2] ss:$0 sm:$0xff]  ;;  %s399_s0 = smov 64   ;;  %s400_s2 = smov 32  }
   0xe   :  { %148 = vmatpush.bf16.msra.mxu0 %v351_v6  ;;  %362 = vmatpush.bf16.msra.mxu2 %v351_v6  ;;  %s268_s5 = sshll.u32 %s500_s3, 4  ;;  %s269_s5 = int_to_ptr.hbm [resolvable:$true] %s268_s5 }
   0xf   :  { %171 = vmatpush.bf16.msra.mxu1 %v355_v7 }
  0x12   :  { %341 = vmatmul.msk.bf16.vlgmr.msra.gmra.mxu1 %vm138_vm0, %v284_v10  ;;  %149 = vmatpush.bf16.msra.mxu0 %v350_v11 }
  0x13   :  { %363 = vmatpush.bf16.msra.mxu2 %v350_v11 }
  0x16   :  { %150 = vmatpush.bf16.msra.mxu0 %v349_v12 }
  0x17   :  { %364 = vmatpush.bf16.msra.mxu2 %v349_v12 }
  0x1a   :  { %151 = vmatpush.bf16.msra.mxu0 %v348_v13 }
  0x1b   :  { %365 = vmatpush.bf16.msra.mxu2 %v348_v13 }
  0x1e   :  { %152 = vmatpush.bf16.msra.mxu0 %v347_v14 }
  0x1f   :  { %366 = vmatpush.bf16.msra.mxu2 %v347_v14 }
  0x21   :  { %153 = vmatmul.bf16.vlgmr.msra.gmra.mxu0 %v280_v21 }
  0x22   :  { %158 = vmatmul.bf16.vlgmr.msra.gmra.mxu2 %v288_v22  ;;  %342 = vmatmul.msk.bf16.gmra.mxu1 %vm138_vm0, %v292_v23 }
  0x8f   :  { %v173_v24 = vpop.f32.mrf.mxu1 }
  0x97   :  { %v175_v25 = vpop.f32.mrf.mxu1 }
  0x9e   :  { %v154_v26 = vpop.f32.mrf.mxu0 }
  0x9f   :  { %v155_v28 = vadd.f32 %v372_v27, %v154_v26  ;;  %v178_v29 = vpop.f32.mrf.mxu1 }
  0xa1   :  { %v174_v32 = vadd.f32 %v173_v24, %v155_v28 }
  0xa3   :  { %v183_v36 = vmax.f32 %v174_v32, 0.0 }
  0xa5   :  { %v159_v30 = vpop.f32.mrf.mxu2 }
  0xa6   :  { %v156_v31 = vpop.f32.mrf.mxu0  ;;  %v160_v35 = vadd.f32 %v372_v27, %v159_v30 }
  0xa7   :  { %v157_v33 = vadd.f32 %v372_v27, %v156_v31  ;;  %v180_v43 = vpop.f32.mrf.mxu1 }
  0xa8   :  { %v179_v40 = vadd.f32 %v178_v29, %v160_v35 }
  0xa9   :  { %v176_v34 = vadd.f32 %v175_v25, %v157_v33 }
  0xaa   :  { %v185_v46 = vmax.f32 %v179_v40, 0.0 }
  0xab   :  { %v184_v37 = vmax.f32 %v176_v34, 0.0 }
  0xad   :  { %v187_v38 = vadd.f32 %v184_v37, %v183_v36  ;;  %v161_v39 = vpop.f32.mrf.mxu2 }
  0xae   :  { %v162_v41 = vadd.f32 %v372_v27, %v161_v39 }
  0xaf   :  { %v188_v42 = vrot.slane %v187_v38, 4 }
  0xb0   :  { %v181_v44 = vadd.f32 %v180_v43, %v162_v41 }
  0xb1   :  { %v189_v45 = vadd.f32 %v188_v42, %v187_v38 }
  0xb2   :  { %v186_v47 = vmax.f32 %v181_v44, 0.0 }
  0xb3   :  { %v190_v49 = vrot.slane %v189_v45, 2 }
  0xb4   :  { %v194_v48 = vadd.f32 %v186_v47, %v185_v46 }
  0xb5   :  { %v191_v52 = vadd.f32 %v190_v49, %v189_v45 }
  0xb6   :  { %v195_v50 = vrot.slane %v194_v48, 4 }
  0xb7   :  { %v192_v54 = vrot.slane %v191_v52, 1 }
  0xb8   :  { %v196_v51 = vadd.f32 %v195_v50, %v194_v48 }
  0xb9   :  { %v193_v57 = vadd.f32 %v192_v54, %v191_v52 }
  0xba   :  { %v197_v53 = vrot.slane %v196_v51, 2 }
  0xbc   :  { %v198_v55 = vadd.f32 %v197_v53, %v196_v51 }
  0xbe   :  { %v199_v56 = vrot.slane %v198_v55, 1 }
  0xc0   :  { %v200_v58 = vadd.f32 %v199_v56, %v198_v55 }
  0xc2   :  { %v204_v59 = vsel %vm203_vm1, %v200_v58, %v193_v57 }
  0xc3   :  { %206 = vrot.lane.b32.xlu0 %v204_v59, %s399_s0 }
 0x135   :  { %v207_v60 = vpop.permute.xlu0 %206 }
 0x136   :  { %v209_v61 = vrot.slane %v207_v60, 1  ;;  %v212_v63 = vadd.f32 %v207_v60, %v193_v57 }
 0x138   :  { %v213_v62 = vadd.f32 %v209_v61, %v200_v58 }
 0x13a   :  { %v216_v0 = vrot.slane %v213_v62, 7 }
 0x13c   :  { %v217_v1 = vsel %vm203_vm1, %v216_v0, %v212_v63 }
 0x13d   :  { %219 = vrot.lane.b32.xlu0 %v217_v1, %s400_s2 }
 0x1af   :  { %v220_v2 = vpop.permute.xlu0 %219 }
 0x1b0   :  { %v222_v3 = vrot.slane %v220_v2, 1  ;;  %v225_v5 = vadd.f32 %v220_v2, %v212_v63 }
 0x1b2   :  { %v226_v4 = vadd.f32 %v222_v3, %v213_v62 }
 0x1b4   :  { %v229_v6 = vrot.slane %v226_v4, 7 }
 0x1b6   :  { %v230_v7 = vsel %vm203_vm1, %v229_v6, %v225_v5 }
 0x1b7   :  { %232 = vrot.lane.b32.xlu1 %v230_v7, %s401_s26 }
 0x229   :  { %v233_v8 = vpop.permute.xlu1 %232 }
 0x22a   :  { %v235_v9 = vrot.slane %v233_v8, 1  ;;  %v238_v11 = vadd.f32 %v233_v8, %v225_v5 }
 0x22c   :  { %v239_v10 = vadd.f32 %v235_v9, %v226_v4 }
 0x22e   :  { %v242_v12 = vrot.slane %v239_v10, 7 }
 0x230   :  { %v243_v13 = vsel %vm203_vm1, %v242_v12, %v238_v11 }
 0x231   :  { %245 = vrot.lane.b32.xlu1 %v243_v13, %s402_s27 }
 0x2a3   :  { %v246_v14 = vpop.permute.xlu1 %245 }
 0x2a4   :  { %v248_v15 = vrot.slane %v246_v14, 1  ;;  %v251_v16 = vadd.f32 %v246_v14, %v238_v11 }
 0x2a6   :  { %v252_v17 = vadd.f32 %v248_v15, %v239_v10  ;;  %v253_v19 = vmul.f32 0.00390625, %v251_v16 }
 0x2a8   :  { %v254_v18 = vmul.f32 0.00390625, %v252_v17 }
 0x2aa   :  { %v257_v20 = vrot.slane %v254_v18, 7 }
 0x2ac   :  { %v258_v21 = vsel %vm203_vm1, %v257_v20, %v253_v19 }
 0x2ad   :  { %260 = vst [vmem:[#allocation2] sm:$0x3] %v258_v21 }
 0x2ae   :  { %271 = dma.vmem_to_hbm [thread:$0]  %s267_s29, 32, %s269_s5, [#allocation3]  }
 0x2af   :  { %397 = dma.done.wait [#allocation3], 32  }
 0x2b0   :  { %398 = vsyncadd [#allocation3], 4294967264 }
 0x2b1   :  { %276 = vsyncpa [#allocation3], 1 }

</bundles_post_ra>
